<compile_context>
chip_gen: v6e
topology: v6e:2x2x1
jax: 0.10.0
libtpu: 0.0.40
codegen_flags: <defaults>
</compile_context>

<pallas_src>
import functools

import jax
import jax.numpy as jnp
from jax.experimental import pallas as pl
from jax.experimental.pallas import tpu as pltpu


_TILE_VMEM_BUDGET = 20 * 1024 * 1024   # double-buffered in+out tile bytes (f32 sizing)
_VMEM_LIMIT_BYTES = 48 * 1024 * 1024   # raise 16/32 MiB scoped defaults; < 64 MiB v7x physical


def _round_up(a, b):
    return ((a + b - 1) // b) * b


def _ln_kernel(x_ref, gb_ref, o_ref, *, eps, inv_c):
    # x_ref: (tm, C_pad)   gb_ref: (2, C_pad) = [gamma; beta]   o_ref: (tm, C_pad)
    y = x_ref[...].astype(jnp.float32)
    gamma = gb_ref[0:1, :]
    beta = gb_ref[1:2, :]
    # Sum-based statistics: exact under zero padding of the feature axis
    # (padded lanes contribute 0 to both sums; inv_c uses the true C).
    s1 = jnp.sum(y, axis=-1, keepdims=True)
    s2 = jnp.sum(y * y, axis=-1, keepdims=True)
    mean = s1 * inv_c
    var = jnp.maximum(s2 * inv_c - mean * mean, 0.0)
    scale = gamma * jax.lax.rsqrt(var + eps)          # fold gamma into the rsqrt scale
    o_ref[...] = ((y - mean) * scale + beta).astype(o_ref.dtype)


def _layer_norm_2d(x2, weight, bias, eps, *, max_tm=1024):
    """LayerNorm over the last axis of a 2-D [M, C] matrix via Pallas."""
    M, C = x2.shape

    # Lane-dense feature axis: pad C to a multiple of 128 (unmasked stores).
    C_pad = _round_up(C, 128)
    w_p = weight.astype(jnp.float32)
    b_p = bias.astype(jnp.float32)
    if C_pad != C:
        x2 = jnp.pad(x2, ((0, 0), (0, C_pad - C)))
        w_p = jnp.pad(w_p, (0, C_pad - C))
        b_p = jnp.pad(b_p, (0, C_pad - C))
    gb = jnp.stack([w_p, b_p], axis=0)                # (2, C_pad): one packed operand

    # Row tile: as big as the VMEM budget allows (double-buffered in + out),
    # multiple of 8, and >= 2 grid steps whenever M permits (v7x: 2 TCs).
    bytes_per_row = C_pad * 4 * 2 * 2                 # f32 in+out, x2 buffers each
    tm_cap = max(8, (_TILE_VMEM_BUDGET // bytes_per_row) // 8 * 8)
    tm = max(8, min(max_tm, tm_cap, _round_up(pl.cdiv(M, 2), 8)))

    M_pad = _round_up(M, tm)
    if M_pad != M:
        x2 = jnp.pad(x2, ((0, M_pad - M), (0, 0)))

    grid = (M_pad // tm,)
    out = pl.pallas_call(
        functools.partial(_ln_kernel, eps=eps, inv_c=1.0 / C),
        out_shape=jax.ShapeDtypeStruct((M_pad, C_pad), x2.dtype),
        grid_spec=pltpu.PrefetchScalarGridSpec(
            num_scalar_prefetch=0,
            grid=grid,
            in_specs=[
                pl.BlockSpec((tm, C_pad), lambda i: (i, 0)),
                pl.BlockSpec((2, C_pad), lambda i: (0, 0)),
            ],
            out_specs=pl.BlockSpec((tm, C_pad), lambda i: (i, 0)),
        ),
        compiler_params=pltpu.CompilerParams(
            dimension_semantics=("parallel",),
            vmem_limit_bytes=_VMEM_LIMIT_BYTES,
        ),
    )(x2, gb)
    return out[:M, :C]


def layer_norm_forward(x, weight, bias, *, eps=1e-6, data_format="channels_last"):
    """Forward of the ConvNeXt LayerNorm module."""
    if data_format == "channels_last":
        C = x.shape[-1]
        lead = x.shape[:-1]
        out2 = _layer_norm_2d(x.reshape(-1, C), weight, bias, eps)
        return out2.reshape(*lead, C)
    elif data_format == "channels_first":
        # Normalize over dim 1 of [B, C, *spatial]: move channels last, run the
        # same kernel, move back.
        # TODO(synk): fuse the NCHW<->NHWC layout change into the kernel with a
        # per-tile transpose to drop one extra HBM round trip.
        perm = (0,) + tuple(range(2, x.ndim)) + (1,)
        xt = jnp.transpose(x, perm)
        C = xt.shape[-1]
        lead = xt.shape[:-1]
        out2 = _layer_norm_2d(xt.reshape(-1, C), weight, bias, eps)
        out = out2.reshape(*lead, C)
        inv_perm = (0, x.ndim - 1) + tuple(range(1, x.ndim - 1))
        return jnp.transpose(out, inv_perm)
    else:
        raise NotImplementedError(data_format)


# ----------------------------- pure-JAX references ---------------------------

def _reference_channels_last(x, w, b, eps):
    mean = jnp.mean(x, axis=-1, keepdims=True)
    var = jnp.mean((x - mean) ** 2, axis=-1, keepdims=True)
    return (x - mean) / jnp.sqrt(var + eps) * w + b


def _reference_channels_first(x, w, b, eps):
    u = jnp.mean(x, axis=1, keepdims=True)
    s = jnp.mean((x - u) ** 2, axis=1, keepdims=True)
    xn = (x - u) / jnp.sqrt(s + eps)
    return w[:, None, None] * xn + b[:, None, None]


if __name__ == "__main__":
    key = jax.random.PRNGKey(0)
    eps = 1e-6
    k1, k2, k3, k4, k5 = jax.random.split(key, 5)

    # channels_last: [batch, seq, hidden] = [2, 8, 32]
    C = 32
    x_cl = jax.random.normal(k1, (2, 8, C), dtype=jnp.float32)
    w_cl = 1.0 + 0.01 * jax.random.normal(k2, (C,), dtype=jnp.float32)
    b_cl = 0.01 * jax.random.normal(k3, (C,), dtype=jnp.float32)

    out_cl = layer_norm_forward(x_cl, w_cl, b_cl, eps=eps, data_format="channels_last")
    out_cl = jax.block_until_ready(out_cl)
    ref_cl = _reference_channels_last(x_cl, w_cl, b_cl, eps)
    assert out_cl.shape == x_cl.shape
    assert jnp.allclose(out_cl, ref_cl, atol=1e-4, rtol=1e-4)

    # channels_first: [batch, channels, H, W] = [2, 4, 16, 16]
    Cf = 4
    x_cf = jax.random.normal(k4, (2, Cf, 16, 16), dtype=jnp.float32)
    w_cf = 1.0 + 0.01 * jax.random.normal(k5, (Cf,), dtype=jnp.float32)
    b_cf = 0.01 * jnp.ones((Cf,), dtype=jnp.float32)

    out_cf = layer_norm_forward(x_cf, w_cf, b_cf, eps=eps, data_format="channels_first")
    out_cf = jax.block_until_ready(out_cf)
    ref_cf = _reference_channels_first(x_cf, w_cf, b_cf, eps)
    assert out_cf.shape == x_cf.shape
    assert jnp.allclose(out_cf, ref_cf, atol=1e-4, rtol=1e-4)

    print("KERNEL_OK")
</pallas_src>

<mosaic_0001>
module attributes {stable_mosaic.version = 11 : i64} {
  func.func @_ln_kernel(%arg0: i32, %arg1: memref<8x128xf32, #tpu.memory_space<vmem>>, %arg2: memref<2x128xf32, #tpu.memory_space<vmem>>, %arg3: memref<8x128xf32, #tpu.memory_space<vmem>>) attributes {dimension_semantics = [#tpu.dimension_semantics<parallel>], iteration_bounds = array<i64: 2>, scalar_prefetch = 0 : i64, scratch_operands = 0 : i64, tpu.core_type = #tpu.core_type<tc>, window_params = [{transform_indices = @transform_0, window_bounds = array<i64: 8, 128>}, {pipeline_mode = #tpu.pipeline_mode<synchronous>, transform_indices = @transform_1, window_bounds = array<i64: 2, 128>}, {transform_indices = @transform_2, window_bounds = array<i64: 8, 128>}]} {
    %c0 = arith.constant 0 : index
    %c0_0 = arith.constant 0 : index
    %0 = vector.load %arg1[%c0, %c0_0] : memref<8x128xf32, #tpu.memory_space<vmem>>, vector<8x128xf32>
    %c0_1 = arith.constant 0 : index
    %c0_2 = arith.constant 0 : index
    %1 = vector.load %arg2[%c0_1, %c0_2] : memref<2x128xf32, #tpu.memory_space<vmem>>, vector<1x128xf32>
    %c1 = arith.constant 1 : index
    %c0_3 = arith.constant 0 : index
    %2 = vector.load %arg2[%c1, %c0_3] : memref<2x128xf32, #tpu.memory_space<vmem>>, vector<1x128xf32>
    %cst = arith.constant dense<0.000000e+00> : vector<8xf32>
    %3 = vector.multi_reduction <add>, %0, %cst [1] : vector<8x128xf32> to vector<8xf32>
    %4 = vector.shape_cast %3 : vector<8xf32> to vector<8x1xf32>
    %5 = arith.mulf %0, %0 : vector<8x128xf32>
    %cst_4 = arith.constant dense<0.000000e+00> : vector<8xf32>
    %6 = vector.multi_reduction <add>, %5, %cst_4 [1] : vector<8x128xf32> to vector<8xf32>
    %7 = vector.shape_cast %6 : vector<8xf32> to vector<8x1xf32>
    %cst_5 = arith.constant 3.125000e-02 : f32
    %8 = vector.broadcast %cst_5 : f32 to vector<8x1xf32>
    %9 = arith.mulf %4, %8 : vector<8x1xf32>
    %cst_6 = arith.constant 3.125000e-02 : f32
    %10 = vector.broadcast %cst_6 : f32 to vector<8x1xf32>
    %11 = arith.mulf %7, %10 : vector<8x1xf32>
    %12 = arith.mulf %9, %9 : vector<8x1xf32>
    %13 = arith.subf %11, %12 : vector<8x1xf32>
    %cst_7 = arith.constant 0.000000e+00 : f32
    %14 = vector.broadcast %cst_7 : f32 to vector<8x1xf32>
    %15 = arith.maximumf %13, %14 : vector<8x1xf32>
    %cst_8 = arith.constant 9.99999997E-7 : f32
    %16 = vector.broadcast %cst_8 : f32 to vector<8x1xf32>
    %17 = arith.addf %15, %16 : vector<8x1xf32>
    %18 = math.rsqrt %17 : vector<8x1xf32>
    %19 = vector.broadcast %1 : vector<1x128xf32> to vector<8x128xf32>
    %20 = vector.broadcast %18 : vector<8x1xf32> to vector<8x128xf32>
    %21 = arith.mulf %19, %20 : vector<8x128xf32>
    %22 = vector.broadcast %9 : vector<8x1xf32> to vector<8x128xf32>
    %23 = arith.subf %0, %22 : vector<8x128xf32>
    %24 = arith.mulf %23, %21 : vector<8x128xf32>
    %25 = vector.broadcast %2 : vector<1x128xf32> to vector<8x128xf32>
    %26 = arith.addf %24, %25 : vector<8x128xf32>
    %c0_9 = arith.constant 0 : index
    %c0_10 = arith.constant 0 : index
    %27 = vector.load %arg3[%c0_9, %c0_10] : memref<8x128xf32, #tpu.memory_space<vmem>>, vector<8x128xf32>
    tpu.vector_store %arg3[%c0_9, %c0_10], %26 {strides = array<i32>} : memref<8x128xf32, #tpu.memory_space<vmem>>, vector<8x128xf32>,
    return
  }
  func.func @transform_0(%arg0: i32) -> (i32, i32) {
    %c0_i32 = arith.constant 0 : i32
    %c0_i32_0 = arith.constant 0 : i32
    return %arg0, %c0_i32 : i32, i32
  }
  func.func @transform_1(%arg0: i32) -> (i32, i32) {
    %c0_i32 = arith.constant 0 : i32
    %c0_i32_0 = arith.constant 0 : i32
    %c0_i32_1 = arith.constant 0 : i32
    return %c0_i32, %c0_i32_0 : i32, i32
  }
  func.func @transform_2(%arg0: i32) -> (i32, i32) {
    %c0_i32 = arith.constant 0 : i32
    %c0_i32_0 = arith.constant 0 : i32
    return %arg0, %c0_i32 : i32, i32
  }
}

</mosaic_0001>

<bundles_post_ra>
// kernel: tpu_custom_call.1
= control target key start
LH: loop header
LB: loop body
LE: loop exit
PB: predicated region body
PF: predicated region fallthrough
CT: control target
= control target key end

     0   :  { %7 = vsyncpa [#allocation3], 0  ;;  %s677_s0 = inlined_call_operand.hbm [shape: f32[16,128], index: 0, kind: input, shape index: {}]   ;;  %s678_s1 = inlined_call_operand.hbm [shape: f32[2,128], index: 1, kind: input, shape index: {}]   ;;  %s679_s2 = inlined_call_operand.hbm [shape: f32[16,128], index: 2, kind: output, shape index: {}]  }
   0x1   :  { %9 = vsyncpa [#allocation3 + $0x1], 0 }
   0x2   :  { %10 = vsyncpa [#allocation6], 0 }
   0x3   :  { %11 = vsyncpa [#allocation4], 0 }
   0x4   :  { %13 = vsyncpa [#allocation4 + $0x1], 0  ;;  %s511_s9 = smov 0   ;;  %s513_s10 = smov 0  }
   0x5   :  { %s515_s11 = smov 0   ;;  %s517_s12 = smov 0  }
   0x6 LB: > { %s532_s13 = sadd.s32 4294967295, %s491_s12   ;;  %s294_s14 = sadd.s32 4294967294, %s491_s12   ;;  %s491_s12 = sphi %s517_s12, %s702_s12   ;;  %s487_s11 = sphi %s515_s11, %s701_s11   ;;  %s483_s10 = sphi %s513_s10, %s700_s10   ;;  %s479_s9 = sphi %s511_s9, %s699_s9  }
   0x7   : > { %p39_p0 = scmp.ne.s32.totalorder %s483_s10, %s479_s9  ;;  %p680_p1 = scmp.eq.s32.totalorder %s532_s13, 0 }
   0x8   : > { %p90_p3 = scmp.eq.s32.totalorder %s294_s14, 1  ;;  %p295_p5 = scmp.ge.s32.totalorder %s491_s12, 1 }
   0x9   : > { %p541_p4 = por %p680_p1, %p39_p0  ;;  %p97_p7 = scmp.lt.s32.totalorder %s491_s12, 3 }
   0xa   : > { %p546_p6 = por %p90_p3, %p39_p0  ;;  %s493_s18 = smov [#allocation5]  }
   0xb   : > { %s684_s15 = scalar_select %p541_p4, 1, 0 }
   0xc   : > { %s685_s16 = scalar_select %p546_p6, 1, 0 }
   0xd   : > { %p551_p8 = pnand %p295_p5, %p97_p7  ;;  %s110_s19 = sshll.u32 %s493_s18, 4  ;;  %s111_s19 = int_to_ptr.vmem [resolvable:$true] %s110_s19 }
   0xe   : > { %s559_s20 = sadd.s32 1, %s491_s12   ;;  %s26_s24 = sadd.s32 1, %s487_s11 }
   0xf   : > { %s686_s17 = scalar_select %p551_p8, 1, 0 }
  0x10   : > { %p318_p10 = pneg %p551_p8  ;;  %s23_s22 = ssub.s32 %s491_s12, %s559_s20 }
  0x11   : > { %p569_p12 = scmp.eq.s32.totalorder %s23_s22, 0  ;;  %p33_p13 = scmp.ne.s32.totalorder %s487_s11, %s483_s10 }
  0x12   : > { %p563_p11 = pnand %p318_p10, %p680_p1  ;;  %s380_s25 = scalar_lea.vmem %s111_s19, 32 }
  0x13   : > { %p381_p3 = scmp.ne.s32.totalorder %s111_s19, %s380_s25  ;;  %p388_p9 = scmp.lt.s32.totalorder %s111_s19, %s111_s19 }
  0x14   : > { %p371_p0 = pneg %p563_p11  ;;  %p389_p2 = scmp.lt.s32.totalorder %s380_s25, %s380_s25 }
  0x16   : > { %p383_p5 = pnand %p381_p3, %p371_p0  ;;  %p390_p10 = por %p389_p2, %p388_p9 }
  0x18   : > { %p384_p7 = pneg %p383_p5 }
  0x1a   : > { %p391_p1 = pnand %p390_p10, %p384_p7 }
  0x1c   : > { %394 = shalt.err (!%p391_p1)
}
  0x1d   : > { %321 = dma.hbm_to_vmem [thread:$0]  (!%p563_p11), %s678_s1, 32, %s111_s19, [#allocation6]  }
  0x1e   : > { %s586_s28 = scalar_select %p569_p12, %s487_s11, %s26_s24  }
  0x1f   : > { %p34_p1 = scmp.eq.s32.totalorder %s491_s12, 0  ;;  %p689_p2 = scmp.eq.s32.totalorder %s532_s13, 1 }
  0x20   : > { %p331_p0 = scmp.lt.s32.totalorder %s491_s12, 2  ;;  %s121_s30 = sand.u32 1, %s487_s11  }
  0x21   : > { %p594_p9 = por %p689_p2, %p33_p13  ;;  %p35_p3 = por %p34_p1, %p33_p13 }
  0x22   : > { %s298_s3 = sshll.u32 %s121_s30, 3  ;;  %s299_s4 = sshll.u32 %s491_s12, 7 }
  0x23   : > { %s690_s29 = scalar_select %p594_p9, 1, 0 }
  0x24   : > { %s607_s7 = scalar_lea.hbm %s677_s0, %s299_s4  ;;  %s125_s8 = scalar_lea.vmem [#allocation2], %s298_s3 }
  0x25   : > { %s132_s14 = sshll.u32 %s125_s8, 4  ;;  %p609_p11 = pnand %p331_p0, %p35_p3  ;;  %s133_s14 = int_to_ptr.vmem [resolvable:$true] %s132_s14 }
  0x26   : > { %s122_s19 = scalar_lea.sflag [#allocation3], %s121_s30  ;;  %s395_s21 = scalar_lea.hbm %s607_s7, 128 }
  0x27   : > { %p396_p12 = scmp.ne.s32.totalorder %s607_s7, %s395_s21  ;;  %p397_p13 = pneg %p609_p11 }
  0x28   : > { %s400_s24 = scalar_lea.hbm %s677_s0, 256  ;;  %p401_p10 = scmp.lt.s32.totalorder %s607_s7, %s677_s0 }
  0x29   : > { %p398_p5 = pnand %p397_p13, %p396_p12  ;;  %p402_p1 = scmp.lt.s32.totalorder %s400_s24, %s395_s21 }
  0x2b   : > { %p399_p7 = pneg %p398_p5  ;;  %p403_p2 = por %p402_p1, %p401_p10 }
  0x2d   : > { %p404_p0 = pnand %p403_p2, %p399_p7 }
  0x2f   : > { %407 = shalt.err (!%p404_p0)
}
  0x30   : > { %s408_s27 = scalar_lea.vmem %s133_s14, 128  ;;  %s494_s30 = smov [#allocation2]  }
  0x31   : > { %p409_p3 = scmp.ne.s32.totalorder %s133_s14, %s408_s27  ;;  %s413_s3 = sshll.u32 %s494_s30, 4  ;;  %s414_s3 = int_to_ptr.vmem [resolvable:$false] %s413_s3 }
  0x32   : > { %s415_s4 = scalar_lea.vmem %s414_s3, 256  ;;  %p416_p12 = scmp.lt.s32.totalorder %s133_s14, %s414_s3 }
  0x33   : > { %p411_p6 = pnand %p409_p3, %p397_p13  ;;  %p417_p5 = scmp.lt.s32.totalorder %s415_s4, %s408_s27 }
  0x35   : > { %p412_p9 = pneg %p411_p6  ;;  %p418_p4 = por %p417_p5, %p416_p12 }
  0x37   : > { %p419_p8 = pnand %p418_p4, %p412_p9 }
  0x39   : > { %422 = shalt.err (!%p419_p8)
}
  0x3a   : > { %325 = dma.hbm_to_vmem [thread:$0]  (!%p609_p11), %s607_s7, 128, %s133_s14, %s122_s19  }
  0x3b   : > { %p692_p7 = scmp.ne.s32.totalorder %s686_s17, 0 }
  0x3c   : > { %s630_s5 = sand.u32 (!%p692_p7), 1, %s483_s10   ;;  %p693_p6 = scmp.ne.s32.totalorder (!%p692_p7), %s684_s15, 0 }
  0x3d   : > { %141 = sbr.rel (%p692_p7) target bundleno = 254 (0xfe), region = 28  ;;  %s301_s6 = sshll.u32 (!%p692_p7), %s630_s5, 3 }
  0x3e   : > { %s144_s8 = scalar_lea.sflag (!%p692_p7), [#allocation3], %s630_s5  ;;  %s147_s21 = scalar_lea.vmem (!%p692_p7), [#allocation2], %s301_s6 }
  0x42   : > { %466 = dma.done.wait (%p693_p6), %s144_s8, 128  }
  0x43   : > { %468 = vsyncadd (%p693_p6), %s144_s8, 4294967168  ;;  %p694_p4 = scmp.eq.s32.totalorder %s532_s13, 0 }
  0x45   : > { %470 = dma.done.wait (%p694_p4), [#allocation6], 32   ;;  %p695_p8 = pmov %p694_p4 }
  0x46   : > { %v172_v0 = vld [vmem:[%s147_s21] sm:$0xff]  ;;  %v304_v10 = vld [vmem:[#allocation5] ss:$0 sm:$0xff]  ;;  %v305_v14 = vld [vmem:[#allocation5 + $0x1] ss:$0 sm:$0xff]  ;;  %s307_s15 = sshll.u32 %s532_s13, 7 }
  0x47   : > { %472 = vsyncadd (%p695_p8), [#allocation6], 4294967264  ;;  %175 = vadd.xlane.f32.xlu0 %v172_v0  ;;  %v177_v1 = vmul.f32 %v172_v0, %v172_v0  ;;  %s171_s17 = scalar_lea.vmem [#allocation7], %s301_s6  ;;  %s212_s19 = scalar_lea.hbm %s679_s2, %s307_s15 }
  0x48   : > { %s214_s7 = sshll.u32 %s171_s17, 4  ;;  %s201_s22 = scalar_lea.sflag [#allocation4], %s630_s5  ;;  %s215_s7 = int_to_ptr.vmem [resolvable:$true] %s214_s7 }
  0x49   : > { %s423_s23 = scalar_lea.vmem %s215_s7, 128  ;;  %p696_p11 = scmp.ne.s32.totalorder %s690_s29, 0 }
  0x4a   : > { %p424_p9 = scmp.ne.s32.totalorder %s215_s7, %s423_s23  ;;  %s495_s24 = smov [#allocation7]  }
  0x4b   : > { %178 = vadd.xlane.f32.xlu0 %v177_v1  ;;  %s427_s25 = sshll.u32 %s495_s24, 4  ;;  %s428_s25 = int_to_ptr.vmem [resolvable:$false] %s427_s25 }
  0x4c   : > { %p425_p13 = pnand %p424_p9, %p696_p11  ;;  %s429_s13 = scalar_lea.vmem %s428_s25, 256 }
  0x4d   : > { %p430_p1 = scmp.lt.s32.totalorder %s215_s7, %s428_s25  ;;  %p431_p2 = scmp.lt.s32.totalorder %s429_s13, %s423_s23 }
  0x4e   : > { %p426_p10 = pneg %p425_p13 }
  0x4f   : > { %p432_p0 = por %p431_p2, %p430_p1 }
  0x51   : > { %p433_p3 = pnand %p432_p0, %p426_p10 }
  0xd0   : > { %v176_v2 = vpop.xlane.xlu0 %175 }
  0xd1   : > { %v180_v3 = vmul.f32 0.03125, %v176_v2 }
  0xd3   : > { %v182_v5 = vmul.f32 %v180_v3, %v180_v3  ;;  %v192_v12 = vsub.f32 %v172_v0, %v180_v3 }
  0xd4   : > { %v179_v4 = vpop.xlane.xlu0 %178 }
  0xd5   : > { %v181_v6 = vmul.f32 0.03125, %v179_v4 }
  0xd7   : > { %v183_v7 = vsub.f32 %v181_v6, %v182_v5 }
  0xd9   : > { %v184_v8 = vmax.f32 %v183_v7, 0.0 }
  0xdb   : > { %v185_v9 = vadd.f32 1e-06, %v184_v8 }
  0xdd   : > { %367 = vrsqrt.f32 %v185_v9 }
  0xea   : > { %v368_v11 = vpop.eup %367 }
  0xeb   : > { %v191_v13 = vmul.f32 %v368_v11, %v304_v10 }
  0xed   : > { %v193_v15 = vmul.f32 %v192_v12, %v191_v13 }
  0xef   : > { %v198_v16 = vadd.f32 %v305_v14, %v193_v15 }
  0xf1   : > { %199 = vst [vmem:[%s171_s17] sm:$0xff] %v198_v16 }
  0xf2   : > { %436 = shalt.err (!%p433_p3)
}
  0xf3   : > { %s437_s26 = scalar_lea.hbm %s212_s19, 128  ;;  %s441_s3 = scalar_lea.hbm %s679_s2, 256 }
  0xf4   : > { %p438_p12 = scmp.ne.s32.totalorder %s212_s19, %s437_s26  ;;  %p442_p6 = scmp.lt.s32.totalorder %s212_s19, %s679_s2 }
  0xf5   : > { %p443_p4 = scmp.lt.s32.totalorder %s441_s3, %s437_s26 }
  0xf6   : > { %p439_p5 = pnand %p438_p12, %p696_p11 }
  0xf7   : > { %p444_p8 = por %p443_p4, %p442_p6 }
  0xf8   : > { %p440_p7 = pneg %p439_p5 }
  0xfa   : > { %p445_p9 = pnand %p444_p8, %p440_p7 }
  0xfc   : > { %448 = shalt.err (!%p445_p9)
}
  0xfd   : > { %316 = dma.vmem_to_hbm [thread:$0]  (%p696_p11), %s215_s7, 128, %s212_s19, %s201_s22  }
  0xfe PF: > { %s226_s6 = sand.u32 1, %s479_s9   ;;  %p697_p13 = scmp.ne.s32.totalorder %s685_s16, 0 }
  0xff   : > { %p698_p10 = scmp.ge.s32.totalorder %s491_s12, 2  ;;  %s227_s8 = scalar_lea.sflag [#allocation4], %s226_s6 }
 0x101   : > { %p327_p1 = pnand %p698_p10, %p697_p13 }
 0x103   : > { %p328_p2 = pneg %p327_p1 }
 0x105   : > { %474 = dma.done.wait (%p328_p2), %s227_s8, 128  }
 0x106   : > { %476 = vsyncadd (%p328_p2), %s227_s8, 4294967168  ;;  %p16_p0 = scmp.ge.s32.totalorder %s559_s20, 4   ;;  %s699_s9 = smov %s483_s10 }
 0x107   : > { %s700_s10 = smov %s487_s11  ;;  %s701_s11 = smov %s586_s28 }
 0x108   : > { %s702_s12 = smov %s559_s20  ;;  %18 = sbr.rel (!%p16_p0) target bundleno = 6 (0x6), region = 77 }
 0x10d   :  { %232 = vsyncpa [#allocation3], 1 }
 0x10e   :  { %234 = vsyncpa [#allocation3 + $0x1], 1 }
 0x10f   :  { %235 = vsyncpa [#allocation6], 1 }
 0x110   :  { %236 = vsyncpa [#allocation4], 1 }
 0x111   :  { %238 = vsyncpa [#allocation4 + $0x1], 1 }

</bundles_post_ra>
